<compile_context>
chip_gen: v7x
topology: tpu7x:2x2x1
jax: 0.10.0
libtpu: 0.0.40
codegen_flags: <defaults>
</compile_context>

<pallas_src>
import math

import jax
import jax.numpy as jnp
from jax.experimental import pallas as pl
from jax.experimental.pallas import tpu as pltpu


def _round_up(x, m):
    return ((x + m - 1) // m) * m


def _vmem_capacity_bytes():
    """Physical VMEM per core for the current generation (conservative fallback)."""
    try:
        return int(pltpu.get_tpu_info().vmem_capacity_bytes)
    except Exception:
        return 64 * 1024 * 1024   # v7x per-TC size = most conservative current part


def _fused_gcn_kernel(x0_hbm, a_hbm, w_ref, b_ref, out_ref, a_vmem, h_ref, dma_sem):
    """One grid step == one GCN layer; A_hat and h stay resident in VMEM scratch."""
    layer = pl.program_id(0)
    n_layers = pl.num_programs(0)

    # Layer 0: single manual DMA of A_hat into its (single-copy) VMEM scratch and
    # of the pre-transformed features x0 = features @ W0 straight into the
    # resident hidden-state scratch (no dedicated x buffer pinned for the kernel).
    @pl.when(layer == 0)
    def _():
        a_cp = pltpu.make_async_copy(a_hbm, a_vmem, dma_sem.at[0])
        x_cp = pltpu.make_async_copy(x0_hbm, h_ref, dma_sem.at[1])
        a_cp.start()
        x_cp.start()
        x_cp.wait()
        a_cp.wait()

    # Layers >= 1: feature transform on the MXU at hidden width (f_pad lanes).
    @pl.when(layer > 0)
    def _():
        h_ref[...] = jnp.dot(h_ref[...], w_ref[0],
                             preferred_element_type=jnp.float32).astype(h_ref.dtype)

    # Normalized aggregation (symmetric norm already folded into A_hat) + bias.
    agg = jnp.dot(a_vmem[...], h_ref[...],
                  preferred_element_type=jnp.float32) + b_ref[0]

    # Hidden layers: ReLU, keep result resident (bf16) for the next layer's MXU.
    @pl.when(layer < n_layers - 1)
    def _():
        h_ref[...] = jnp.maximum(agg, 0.0).astype(h_ref.dtype)

    # Last layer: no activation; write the f32 logits (lane-dense 128-wide slab).
    @pl.when(layer == n_layers - 1)
    def _():
        out_ref[...] = agg


def prepare_gcn(adj, norm, params):
    """One-time, per-graph preprocessing (hoisted out of the per-forward path)."""
    n = adj.shape[0]
    num_layers = len(params)
    assert num_layers >= 2, "GCN_model always has at least input + output layers"
    n_classes = params[-1][0].shape[1]

    # Fused-loop lane width from hidden/class widths only: in_feats is excluded
    # because layer 0's feature transform runs as a plain XLA matmul outside.
    widths = [params[0][0].shape[1]]
    for (w, _) in params[1:]:
        widths += [w.shape[0], w.shape[1]]
    f_pad = _round_up(max(widths + [128]), 128)
    n_pad = _round_up(max(n, 128), 128)

    # Fold the symmetric norm into the adjacency once: A_hat = diag(n) A diag(n).
    a_hat = (norm * adj) * norm.reshape(1, -1)
    a_hat_p = jnp.zeros((n_pad, n_pad), jnp.float32).at[:n, :n].set(a_hat)
    a_hat_p = a_hat_p.astype(jnp.bfloat16)

    # Layer-0 weight kept separate (its in_feats width never enters the kernel).
    w0 = params[0][0].astype(jnp.float32)

    # Per-layer W/b stacks; W slot 0 is an unused zero dummy so the grid index
    # map stays the identity (layer 0's transform happens outside the kernel).
    w_stack = jnp.zeros((num_layers, f_pad, f_pad), jnp.float32)
    b_stack = jnp.zeros((num_layers, 1, f_pad), jnp.float32)
    b_stack = b_stack.at[0, 0, :params[0][1].shape[0]].set(params[0][1])
    for li in range(1, num_layers):
        w, b = params[li]
        fi, fo = w.shape
        w_stack = w_stack.at[li, :fi, :fo].set(w)
        b_stack = b_stack.at[li, 0, :fo].set(b)
    w_stack = w_stack.astype(jnp.bfloat16)

    return dict(a_hat=a_hat_p, w0=w0, w_stack=w_stack, b_stack=b_stack,
                n=n, n_pad=n_pad, f_pad=f_pad,
                num_layers=num_layers, n_classes=n_classes)


def make_gcn_forward(prep):
    """Build a jitted forward(features) closure over the prepared graph/params."""
    a_hat, w0 = prep["a_hat"], prep["w0"]
    w_stack, b_stack = prep["w_stack"], prep["b_stack"]
    n, n_pad, f_pad = prep["n"], prep["n_pad"], prep["f_pad"]
    num_layers, n_classes = prep["num_layers"], prep["n_classes"]

    # ---- exact VMEM footprint (generation-aware budget) ----
    a_bytes = n_pad * n_pad * 2               # A_hat scratch (bf16, single copy)
    h_bytes = n_pad * f_pad * 2               # resident hidden state (bf16)
    out_bytes = 2 * n_pad * f_pad * 4         # f32 output slab, pipeline double-buffered
    w_bytes = 2 * f_pad * f_pad * 2           # streamed weights, double-buffered
    b_bytes = 2 * 8 * f_pad * 4               # streamed bias blocks (sublane-padded)
    footprint = a_bytes + h_bytes + out_bytes + w_bytes + b_bytes
    headroom = 4 * 1024 * 1024                # Mosaic internal scratch, semaphores
    reserve = 8 * 1024 * 1024                 # leave room for XLA / runtime
    cap = _vmem_capacity_bytes()
    if footprint + headroom > cap - reserve:
        # TODO(synk): tiled/streaming variant (row-tiled A, per-layer re-read).
        raise ValueError(
            f"graph too large for the VMEM-resident fused kernel "
            f"({footprint + headroom} B needed, {cap - reserve} B available)")
    vmem_limit = int(min(max(footprint + headroom, 32 * 1024 * 1024), cap - reserve))

    fused = pl.pallas_call(
        _fused_gcn_kernel,
        out_shape=jax.ShapeDtypeStruct((n_pad, f_pad), jnp.float32),
        grid_spec=pltpu.PrefetchScalarGridSpec(
            num_scalar_prefetch=0,
            grid=(num_layers,),
            in_specs=[
                # x0 and A_hat stay in HBM; copied once by manual DMA at layer 0.
                pl.BlockSpec(memory_space=pl.ANY),                     # x0
                pl.BlockSpec(memory_space=pl.ANY),                     # A_hat
                # Per-layer weight / bias blocks stream (pipeline double-buffers).
                pl.BlockSpec((1, f_pad, f_pad), lambda l: (l, 0, 0)),  # W_l
                pl.BlockSpec((1, 1, f_pad), lambda l: (l, 0, 0)),      # b_l
            ],
            out_specs=pl.BlockSpec((n_pad, f_pad), lambda l: (0, 0)),
            scratch_shapes=[
                pltpu.VMEM((n_pad, n_pad), jnp.bfloat16),   # resident A_hat
                pltpu.VMEM((n_pad, f_pad), jnp.bfloat16),   # resident hidden h
                pltpu.SemaphoreType.DMA((2,)),
            ],
        ),
        compiler_params=pltpu.CompilerParams(
            dimension_semantics=("arbitrary",),   # layer axis carries state
            vmem_limit_bytes=vmem_limit,
        ),
    )

    @jax.jit
    def forward(features):
        # Split-out layer-0 feature transform (the only op at in_feats width).
        n_hidden0 = w0.shape[1]
        x0 = features.astype(jnp.float32) @ w0
        x0_p = jnp.zeros((n_pad, f_pad), jnp.bfloat16)
        x0_p = x0_p.at[:features.shape[0], :n_hidden0].set(x0.astype(jnp.bfloat16))
        out_p = fused(x0_p, a_hat, w_stack, b_stack)
        return out_p[:n, :n_classes]

    return forward


def init_gcn_params(key, in_feats, n_hidden, n_classes, n_layers):
    """Matches GCN_model.__init__: [in->hid] + (n_layers-1)*[hid->hid] + [hid->classes]."""
    dims = ([(in_feats, n_hidden)]
            + [(n_hidden, n_hidden)] * (n_layers - 1)
            + [(n_hidden, n_classes)])
    params = []
    for (fi, fo) in dims:
        key, kw, kb = jax.random.split(key, 3)
        stdv = 1.0 / math.sqrt(fo)
        w = jax.random.uniform(kw, (fi, fo), jnp.float32, minval=-stdv, maxval=stdv)
        b = jax.random.uniform(kb, (fo,), jnp.float32, minval=-stdv, maxval=stdv)
        params.append((w, b))
    return params


def gcn_model_ref(adj, norm, features, params):
    """Pure-JAX f32 reference with the ORIGINAL (un-folded) per-layer semantics."""
    h = features
    n_layers_total = len(params)
    for li, (w, b) in enumerate(params):
        h = h @ w
        h = h * norm
        h = adj @ h
        h = h * norm
        h = h + b.reshape(1, -1)
        if li < n_layers_total - 1:
            h = jnp.maximum(h, 0.0)
    return h


if __name__ == "__main__":
    # Small synthetic graph + features consistent with GCN_model(in_feats, n_hidden, n_classes, ...)
    N = 16          # nodes
    in_feats = 64   # wider than hidden, like typical GCN inputs (handled outside the fused loop)
    n_hidden = 32
    n_classes = 4
    n_layers = 2    # -> 3 GCNLayers total

    key = jax.random.PRNGKey(0)
    key, k_adj, k_feat, k_param = jax.random.split(key, 4)

    # Dense symmetric adjacency with self-loops (synthetic graph).
    rand = jax.random.uniform(k_adj, (N, N))
    adj = (rand + rand.T > 1.4).astype(jnp.float32)
    adj = jnp.maximum(adj, jnp.eye(N, dtype=jnp.float32))  # self-loops

    # Symmetric GCN norm: deg^{-1/2}, shape (N, 1) like g.ndata['norm'].
    deg = adj.sum(axis=1)
    norm = jnp.where(deg > 0, 1.0 / jnp.sqrt(deg), 0.0).reshape(N, 1).astype(jnp.float32)

    features = jax.random.normal(k_feat, (N, in_feats), jnp.float32)
    params = init_gcn_params(k_param, in_feats, n_hidden, n_classes, n_layers)

    # One-time preprocessing (fold norm into A, pad, stack, cast) + jitted forward.
    prep = prepare_gcn(adj, norm, features_params := params)
    forward = make_gcn_forward(prep)

    out = forward(features)
    out = jax.block_until_ready(out)

    ref = gcn_model_ref(adj, norm, features, params)
    assert out.shape == (N, n_classes), out.shape
    # bf16 operands (A_hat / h / W) with f32 accumulation -> loosened tolerance vs f32 ref.
    assert jnp.allclose(out, ref, atol=5e-2, rtol=5e-2), "Pallas output mismatch vs reference"

    print("KERNEL_OK")
</pallas_src>

<mosaic_0001>
module attributes {stable_mosaic.version = 11 : i64} {
  func.func @_fused_gcn_kernel(%arg0: i32, %arg1: memref<128x128xbf16, #tpu.memory_space<any>>, %arg2: memref<128x128xbf16, #tpu.memory_space<any>>, %arg3: memref<1x128x128xbf16, #tpu.memory_space<vmem>>, %arg4: memref<1x1x128xf32, #tpu.memory_space<vmem>>, %arg5: memref<128x128xf32, #tpu.memory_space<vmem>>, %arg6: memref<128x128xbf16, #tpu.memory_space<vmem>>, %arg7: memref<128x128xbf16, #tpu.memory_space<vmem>>, %arg8: memref<2x!tpu.dma_semaphore, #tpu.memory_space<semaphore_mem>>) attributes {dimension_semantics = [#tpu.dimension_semantics<arbitrary>], iteration_bounds = array<i64: 3>, scalar_prefetch = 0 : i64, scratch_operands = 3 : i64, tpu.core_type = #tpu.core_type<tc>, window_params = [{}, {}, {transform_indices = @transform_2, window_bounds = array<i64: 1, 128, 128>}, {transform_indices = @transform_3, window_bounds = array<i64: 1, 1, 128>}, {pipeline_mode = #tpu.pipeline_mode<synchronous>, transform_indices = @transform_4, window_bounds = array<i64: 128, 128>}]} {
    %c0_i32 = arith.constant 0 : i32
    %0 = arith.cmpi eq, %arg0, %c0_i32 : i32
    %1 = arith.extui %0 : i1 to i32
    %c0_i32_0 = arith.constant 0 : i32
    %2 = arith.cmpi ne, %1, %c0_i32_0 : i32
    scf.if %2 {
      %c0_i32_12 = arith.constant 0 : i32
      %19 = tpu.memref_slice %arg8[%c0_i32_12] : memref<2x!tpu.dma_semaphore, #tpu.memory_space<semaphore_mem>> -> memref<1x!tpu.dma_semaphore, #tpu.memory_space<semaphore_mem>>
      %20 = tpu.memref_squeeze %19 : memref<1x!tpu.dma_semaphore, #tpu.memory_space<semaphore_mem>> -> memref<!tpu.dma_semaphore, #tpu.memory_space<semaphore_mem>>
      tpu.enqueue_dma source(%arg2 : memref<128x128xbf16, #tpu.memory_space<any>>) target(%arg6 : memref<128x128xbf16, #tpu.memory_space<vmem>>) target_semaphore(%20 : memref<!tpu.dma_semaphore, #tpu.memory_space<semaphore_mem>>)
      %c1_i32 = arith.constant 1 : i32
      %21 = tpu.memref_slice %arg8[%c1_i32] : memref<2x!tpu.dma_semaphore, #tpu.memory_space<semaphore_mem>> -> memref<1x!tpu.dma_semaphore, #tpu.memory_space<semaphore_mem>>
      %22 = tpu.memref_squeeze %21 : memref<1x!tpu.dma_semaphore, #tpu.memory_space<semaphore_mem>> -> memref<!tpu.dma_semaphore, #tpu.memory_space<semaphore_mem>>
      tpu.enqueue_dma source(%arg1 : memref<128x128xbf16, #tpu.memory_space<any>>) target(%arg7 : memref<128x128xbf16, #tpu.memory_space<vmem>>) target_semaphore(%22 : memref<!tpu.dma_semaphore, #tpu.memory_space<semaphore_mem>>)
      %c1_i32_13 = arith.constant 1 : i32
      %23 = tpu.memref_slice %arg8[%c1_i32_13] : memref<2x!tpu.dma_semaphore, #tpu.memory_space<semaphore_mem>> -> memref<1x!tpu.dma_semaphore, #tpu.memory_space<semaphore_mem>>
      %24 = tpu.memref_squeeze %23 : memref<1x!tpu.dma_semaphore, #tpu.memory_space<semaphore_mem>> -> memref<!tpu.dma_semaphore, #tpu.memory_space<semaphore_mem>>
      tpu.wait_dma2 semaphore(%24 : memref<!tpu.dma_semaphore, #tpu.memory_space<semaphore_mem>>) src(%arg1 : memref<128x128xbf16, #tpu.memory_space<any>>) dst(%arg7 : memref<128x128xbf16, #tpu.memory_space<vmem>>)
      %c0_i32_14 = arith.constant 0 : i32
      %25 = tpu.memref_slice %arg8[%c0_i32_14] : memref<2x!tpu.dma_semaphore, #tpu.memory_space<semaphore_mem>> -> memref<1x!tpu.dma_semaphore, #tpu.memory_space<semaphore_mem>>
      %26 = tpu.memref_squeeze %25 : memref<1x!tpu.dma_semaphore, #tpu.memory_space<semaphore_mem>> -> memref<!tpu.dma_semaphore, #tpu.memory_space<semaphore_mem>>
      tpu.wait_dma2 semaphore(%26 : memref<!tpu.dma_semaphore, #tpu.memory_space<semaphore_mem>>) src(%arg2 : memref<128x128xbf16, #tpu.memory_space<any>>) dst(%arg6 : memref<128x128xbf16, #tpu.memory_space<vmem>>)
    } else {
    }
    %c0_i32_1 = arith.constant 0 : i32
    %3 = arith.cmpi sgt, %arg0, %c0_i32_1 : i32
    %4 = arith.extui %3 : i1 to i32
    %c0_i32_2 = arith.constant 0 : i32
    %5 = arith.cmpi ne, %4, %c0_i32_2 : i32
    scf.if %5 {
      %c0_12 = arith.constant 0 : index
      %c0_13 = arith.constant 0 : index
      %19 = vector.load %arg7[%c0_12, %c0_13] : memref<128x128xbf16, #tpu.memory_space<vmem>>, vector<128x128xbf16>
      %c0_14 = arith.constant 0 : index
      %c0_15 = arith.constant 0 : index
      %c0_16 = arith.constant 0 : index
      %20 = vector.load %arg3[%c0_14, %c0_15, %c0_16] : memref<1x128x128xbf16, #tpu.memory_space<vmem>>, vector<1x128x128xbf16>
      %21 = vector.shape_cast %20 : vector<1x128x128xbf16> to vector<128x128xbf16>
      %cst_17 = arith.constant dense<0.000000e+00> : vector<128x128xf32>
      %22 = tpu.matmul %19, %21, %cst_17 {dimension_numbers = #tpu.dot_dimension_numbers<[1], [0], [0], [1], [0, 0, 1, 1], [], []>} : vector<128x128xbf16>, vector<128x128xbf16>, vector<128x128xf32> -> vector<128x128xf32>
      %23 = arith.truncf %22 : vector<128x128xf32> to vector<128x128xbf16>
      %c0_18 = arith.constant 0 : index
      %c0_19 = arith.constant 0 : index
      %24 = vector.load %arg7[%c0_18, %c0_19] : memref<128x128xbf16, #tpu.memory_space<vmem>>, vector<128x128xbf16>
      tpu.vector_store %arg7[%c0_18, %c0_19], %23 {strides = array<i32>} : memref<128x128xbf16, #tpu.memory_space<vmem>>, vector<128x128xbf16>,
    } else {
    }
    %c0 = arith.constant 0 : index
    %c0_3 = arith.constant 0 : index
    %6 = vector.load %arg6[%c0, %c0_3] : memref<128x128xbf16, #tpu.memory_space<vmem>>, vector<128x128xbf16>
    %c0_4 = arith.constant 0 : index
    %c0_5 = arith.constant 0 : index
    %7 = vector.load %arg7[%c0_4, %c0_5] : memref<128x128xbf16, #tpu.memory_space<vmem>>, vector<128x128xbf16>
    %cst = arith.constant dense<0.000000e+00> : vector<128x128xf32>
    %8 = tpu.matmul %6, %7, %cst {dimension_numbers = #tpu.dot_dimension_numbers<[1], [0], [0], [1], [0, 0, 1, 1], [], []>} : vector<128x128xbf16>, vector<128x128xbf16>, vector<128x128xf32> -> vector<128x128xf32>
    %c0_6 = arith.constant 0 : index
    %c0_7 = arith.constant 0 : index
    %c0_8 = arith.constant 0 : index
    %9 = vector.load %arg4[%c0_6, %c0_7, %c0_8] : memref<1x1x128xf32, #tpu.memory_space<vmem>>, vector<1x1x128xf32>
    %10 = vector.shape_cast %9 : vector<1x1x128xf32> to vector<1x128xf32>
    %11 = vector.broadcast %10 : vector<1x128xf32> to vector<128x128xf32>
    %12 = arith.addf %8, %11 : vector<128x128xf32>
    %c2_i32 = arith.constant 2 : i32
    %13 = arith.cmpi slt, %arg0, %c2_i32 : i32
    %14 = arith.extui %13 : i1 to i32
    %c0_i32_9 = arith.constant 0 : i32
    %15 = arith.cmpi ne, %14, %c0_i32_9 : i32
    scf.if %15 {
      %cst_12 = arith.constant 0.000000e+00 : f32
      %19 = vector.broadcast %cst_12 : f32 to vector<128x128xf32>
      %20 = arith.maximumf %12, %19 : vector<128x128xf32>
      %21 = arith.truncf %20 : vector<128x128xf32> to vector<128x128xbf16>
      %c0_13 = arith.constant 0 : index
      %c0_14 = arith.constant 0 : index
      %22 = vector.load %arg7[%c0_13, %c0_14] : memref<128x128xbf16, #tpu.memory_space<vmem>>, vector<128x128xbf16>
      tpu.vector_store %arg7[%c0_13, %c0_14], %21 {strides = array<i32>} : memref<128x128xbf16, #tpu.memory_space<vmem>>, vector<128x128xbf16>,
    } else {
    }
    %c2_i32_10 = arith.constant 2 : i32
    %16 = arith.cmpi eq, %arg0, %c2_i32_10 : i32
    %17 = arith.extui %16 : i1 to i32
    %c0_i32_11 = arith.constant 0 : i32
    %18 = arith.cmpi ne, %17, %c0_i32_11 : i32
    scf.if %18 {
      %c0_12 = arith.constant 0 : index
      %c0_13 = arith.constant 0 : index
      %19 = vector.load %arg5[%c0_12, %c0_13] : memref<128x128xf32, #tpu.memory_space<vmem>>, vector<128x128xf32>
      tpu.vector_store %arg5[%c0_12, %c0_13], %12 {strides = array<i32>} : memref<128x128xf32, #tpu.memory_space<vmem>>, vector<128x128xf32>,
    } else {
    }
    return
  }
  func.func @transform_2(%arg0: i32) -> (i32, i32, i32) {
    %c0_i32 = arith.constant 0 : i32
    %c0_i32_0 = arith.constant 0 : i32
    %c0_i32_1 = arith.constant 0 : i32
    return %arg0, %c0_i32, %c0_i32_0 : i32, i32, i32
  }
  func.func @transform_3(%arg0: i32) -> (i32, i32, i32) {
    %c0_i32 = arith.constant 0 : i32
    %c0_i32_0 = arith.constant 0 : i32
    %c0_i32_1 = arith.constant 0 : i32
    return %arg0, %c0_i32, %c0_i32_0 : i32, i32, i32
  }
  func.func @transform_4(%arg0: i32) -> (i32, i32) {
    %c0_i32 = arith.constant 0 : i32
    %c0_i32_0 = arith.constant 0 : i32
    %c0_i32_1 = arith.constant 0 : i32
    return %c0_i32, %c0_i32_0 : i32, i32
  }
}

</mosaic_0001>

<bundles_post_ra>
// kernel: forward.1
= control target key start
LH: loop header
LB: loop body
LE: loop exit
PB: predicated region body
PF: predicated region fallthrough
CT: control target
= control target key end

     0   :  { %9 = vsyncpa [#allocation6], 0  ;;  %s1278_s0 = inlined_call_operand.vmem [shape: bf16[128,128], index: 0, kind: input, shape index: {}]   ;;  %s1279_s1 = inlined_call_operand.vmem [shape: bf16[128,128], index: 1, kind: input, shape index: {}]   ;;  %s1280_s2 = inlined_call_operand.hbm [shape: bf16[3,128,128], index: 2, kind: input, shape index: {}]   ;;  %s1281_s3 = inlined_call_operand.vmem [shape: f32[3,1,128], index: 3, kind: input, shape index: {}]   ;;  %s1282_s4 = inlined_call_operand.vmem [shape: f32[128,128], index: 4, kind: output, shape index: {}]  }
   0x1   :  { %11 = vsyncpa [#allocation6 + $0x1], 0  ;;  %s1032_s15 = smov 0   ;;  %s1034_s16 = smov 0  }
   0x2   :  { %s1036_s17 = smov 0   ;;  %s1038_s18 = smov 0  }
   0x3 LB: > { %s1051_s19 = sadd.s32 4294967295, %s1002_s18   ;;  %s1054_s20 = sadd.s32 1, %s1002_s18   ;;  %s1002_s18 = sphi %s1038_s18, %s1289_s18   ;;  %s998_s17 = sphi %s1036_s17, %s1288_s17   ;;  %s994_s16 = sphi %s1034_s16, %s1287_s16   ;;  %s990_s15 = sphi %s1032_s15, %s1286_s15  }
   0x4   : > { %s21_s21 = ssub.s32 %s1002_s18, %s1054_s20  ;;  %s24_s22 = sadd.s32 1, %s998_s17 }
   0x5   : > { %p22_p0 = scmp.eq.s32.totalorder %s21_s21, 0  ;;  %p31_p1 = scmp.ne.s32.totalorder %s998_s17, %s994_s16 }
   0x6   : > { %p32_p2 = scmp.eq.s32.totalorder %s1002_s18, 0  ;;  %p37_p3 = scmp.ne.s32.totalorder %s994_s16, %s990_s15 }
   0x7   : > { %s1064_s23 = scalar_select %p22_p0, %s998_s17, %s24_s22  }
   0x8   : > { %p33_p4 = por %p32_p2, %p31_p1  ;;  %p38_p5 = scmp.eq.s32.totalorder %s1051_s19, 0 }
   0x9   : > { %p891_p6 = scmp.lt.s32.totalorder %s1002_s18, 3  ;;  %s108_s25 = sand.u32 1, %s998_s17  }
   0xa   : > { %p1068_p7 = por %p38_p5, %p37_p3  ;;  %s734_s26 = sshll.u32 %s108_s25, 6 }
   0xb   : > { %s756_s27 = sshll.u32 %s1002_s18, 10  ;;  %s112_s5 = scalar_lea.vmem [#allocation5], %s734_s26 }
   0xc   : > { %s1077_s30 = scalar_lea.hbm %s1280_s2, %s756_s27  ;;  %s119_s6 = sshll.u32 %s112_s5, 4  ;;  %s1079_s6 = int_to_ptr.vmem [resolvable:$true] %s119_s6 }
   0xd   : > { %p1081_p8 = pnand %p891_p6, %p33_p4  ;;  %s1086_s8 = scalar_lea.sflag [#allocation6], %s108_s25 }
   0xe   : > { %s934_s9 = scalar_lea.hbm %s1077_s30, 1024  ;;  %s939_s12 = scalar_lea.hbm %s1280_s2, 3072 }
   0xf   : > { %p935_p10 = scmp.ne.s32.totalorder %s1077_s30, %s934_s9  ;;  %p936_p11 = pneg %p1081_p8 }
  0x10   : > { %p940_p0 = scmp.lt.u32.totalorder %s1077_s30, %s1280_s2  ;;  %p941_p1 = scmp.lt.u32.totalorder %s939_s12, %s934_s9 }
  0x11   : > { %p937_p12 = pnand %p936_p11, %p935_p10  ;;  %p943_p3 = scmp.lt.u32.totalorder %s934_s9, %s1077_s30 }
  0x12   : > { %p942_p2 = por %p941_p1, %p940_p0 }
  0x13   : > { %p938_p13 = pneg %p937_p12 }
  0x14   : > { %p944_p4 = por %p943_p3, %p942_p2 }
  0x16   : > { %p945_p5 = pnand %p944_p4, %p938_p13 }
  0x18   : > { %948 = shalt.err (!%p945_p5)
}
  0x19   : > { %s949_s15 = scalar_lea.vmem %s1079_s6, 1024  ;;  %s1004_s21 = smov [#allocation5]  }
  0x1a   : > { %p950_p6 = scmp.ne.s32.totalorder %s1079_s6, %s949_s15  ;;  %s954_s22 = sshll.u32 %s1004_s21, 4  ;;  %s955_s22 = int_to_ptr.vmem [resolvable:$false] %s954_s22 }
  0x1b   : > { %s956_s25 = scalar_lea.vmem %s955_s22, 2048  ;;  %p957_p9 = scmp.lt.s32.totalorder %s1079_s6, %s955_s22 }
  0x1c   : > { %p952_p10 = pnand %p950_p6, %p936_p11  ;;  %p958_p0 = scmp.lt.s32.totalorder %s956_s25, %s949_s15 }
  0x1e   : > { %p953_p12 = pneg %p952_p10  ;;  %p959_p1 = por %p958_p0, %p957_p9 }
  0x20   : > { %p960_p2 = pnand %p959_p1, %p953_p12 }
  0x22   : > { %963 = shalt.err (!%p960_p2)
}
  0x23   : > { %s1005_s26 = smov 64   ;;  %s1006_s27 = smov 4  }
  0x24   : > { %890 = dma.hbm_to_vmem [thread:$0]  (!%p1081_p8), %s1077_s30, 1024, %s1079_s6, %s1086_s8, %s1005_s26, %s1005_s26, %s1006_s27  }
  0x25   : > { %p133_p11 = scmp.lt.s32.totalorder %s1002_s18, 4  ;;  %p1285_p13 = scmp.ge.s32.totalorder %s1002_s18, 1 }
  0x27   : > { %p134_p3 = pnand %p1285_p13, %p133_p11 }
  0x28   : > { %s139_s28 = sand.u32 (!%p134_p3), 1, %s994_s16  }
  0x29   : > { %137 = sbr.rel (%p134_p3) target bundleno = 601 (0x259), region = 28  ;;  %s738_s29 = sshll.u32 (!%p134_p3), %s139_s28, 6 }
  0x2a   : > { %s140_s5 = scalar_lea.sflag (!%p134_p3), [#allocation6], %s139_s28  ;;  %s1118_s9 = scalar_lea.vmem (!%p134_p3), [#allocation5], %s738_s29 }
  0x30   : > { %981 = dma.done.wait (%p1068_p7), %s140_s5, 1024  }
  0x31   : > { %983 = vsyncadd (%p1068_p7), %s140_s5, 4294966272  ;;  %p162_p9 = scmp.lt.s32.totalorder %s1051_s19, 2  ;;  %p739_p8 = scmp.ne.s32.totalorder %s1051_s19, 0 }
  0x32   : > { %v202_v0 = vld [vmem:[%s1279_s1] sm:$0xff] (!%p739_p8)  ;;  %v204_v1 = vld [vmem:[%s1279_s1 + $0x8] sm:$0xff] (!%p739_p8)  ;;  %v206_v2 = vld [vmem:[%s1279_s1 + $0x10] sm:$0xff] (!%p739_p8) }
  0x33   : > { %s1126_s30 = scalar_select %p162_p9, %s1051_s19, 2 }
  0x34   : > { %169 = sbr.rel (%p739_p8) target bundleno = 69 (0x45), region = 36  ;;  %203 = vst [vmem:[#allocation2] sm:$0xff] (!%p739_p8), %v202_v0  ;;  %205 = vst [vmem:[#allocation2 + $0x8] sm:$0xff] (!%p739_p8), %v204_v1  ;;  %v208_v3 = vld [vmem:[%s1279_s1 + $0x18] sm:$0xff] (!%p739_p8)  ;;  %v210_v4 = vld [vmem:[%s1279_s1 + $0x20] sm:$0xff] (!%p739_p8) }
  0x35   : > { %s164_s7 = scalar_lea.vmem %s1281_s3, %s1126_s30  ;;  %207 = vst [vmem:[#allocation2 + $0x10] sm:$0xff] (!%p739_p8), %v206_v2  ;;  %v212_v5 = vld [vmem:[%s1279_s1 + $0x28] sm:$0xff] (!%p739_p8)  ;;  %209 = vst [vmem:[#allocation2 + $0x18] sm:$0xff] (!%p739_p8), %v208_v3  ;;  %v214_v6 = vld [vmem:[%s1279_s1 + $0x30] sm:$0xff] (!%p739_p8) }
  0x36   : > { %211 = vst [vmem:[#allocation2 + $0x20] sm:$0xff] (!%p739_p8), %v210_v4  ;;  %213 = vst [vmem:[#allocation2 + $0x28] sm:$0xff] (!%p739_p8), %v212_v5  ;;  %v216_v7 = vld [vmem:[%s1279_s1 + $0x38] sm:$0xff] (!%p739_p8) }
  0x37   : > { %215 = vst [vmem:[#allocation2 + $0x30] sm:$0xff] (!%p739_p8), %v214_v6  ;;  %217 = vst [vmem:[#allocation2 + $0x38] sm:$0xff] (!%p739_p8), %v216_v7 }
  0x3b   : > { %225 = vsyncadd [#allocation4], 1024  ;;  %v259_v8 = vld [vmem:[%s1278_s0] sm:$0xff]  ;;  %v261_v9 = vld [vmem:[%s1278_s0 + $0x8] sm:$0xff] }
  0x3c   : > { %260 = vst [vmem:[#allocation3] sm:$0xff] %v259_v8  ;;  %262 = vst [vmem:[#allocation3 + $0x8] sm:$0xff] %v261_v9  ;;  %v263_v10 = vld [vmem:[%s1278_s0 + $0x10] sm:$0xff]  ;;  %v265_v11 = vld [vmem:[%s1278_s0 + $0x18] sm:$0xff] }
  0x3d   : > { %v267_v12 = vld [vmem:[%s1278_s0 + $0x20] sm:$0xff]  ;;  %264 = vst [vmem:[#allocation3 + $0x10] sm:$0xff] %v263_v10  ;;  %266 = vst [vmem:[#allocation3 + $0x18] sm:$0xff] %v265_v11  ;;  %v269_v13 = vld [vmem:[%s1278_s0 + $0x28] sm:$0xff] }
  0x3e   : > { %268 = vst [vmem:[#allocation3 + $0x20] sm:$0xff] %v267_v12  ;;  %v271_v14 = vld [vmem:[%s1278_s0 + $0x30] sm:$0xff]  ;;  %v273_v15 = vld [vmem:[%s1278_s0 + $0x38] sm:$0xff]  ;;  %270 = vst [vmem:[#allocation3 + $0x28] sm:$0xff] %v269_v13 }
  0x3f   : > { %272 = vst [vmem:[#allocation3 + $0x30] sm:$0xff] %v271_v14  ;;  %274 = vst [vmem:[#allocation3 + $0x38] sm:$0xff] %v273_v15 }
  0x40   : > { %282 = vsyncadd [#allocation4 + $0x1], 1024 }
  0x41   : > { %984 = dma.done.wait [#allocation4 + $0x1], 1024 }
  0x42   : > { %985 = vsyncadd [#allocation4 + $0x1], 4294966272 }
  0x43   : > { %986 = dma.done.wait [#allocation4], 1024 }
  0x44   : > { %987 = vsyncadd [#allocation4], 4294966272 }
  0x45 PF: > { %p740_p7 = scmp.le.s32.totalorder %s1051_s19, 0 }
  0x46   : > { %v926_v16 = vld [vmem:[%s1118_s9] sm:$0xff] (!%p740_p7)   ;;  %v927_v17 = vld [vmem:[%s1118_s9 + $0x8] sm:$0xff] (!%p740_p7)   ;;  %v928_v18 = vld [vmem:[%s1118_s9 + $0x10] sm:$0xff] (!%p740_p7)  }
  0x47   : > { %292 = sbr.rel (%p740_p7) target bundleno = 329 (0x149), region = 108  ;;  %789 = vmatprep.subr.bf16.mxu0 (!%p740_p7), %v926_v16  ;;  %853 = vmatprep.subr.bf16.mxu1 (!%p740_p7), %v926_v16  ;;  %v929_v19 = vld [vmem:[%s1118_s9 + $0x18] sm:$0xff] (!%p740_p7)   ;;  %v293_v20 = vld [vmem:[#allocation3] sm:$0xff] (!%p740_p7)  ;;  %v931_v23 = vld [vmem:[%s1118_s9 + $0x28] sm:$0xff] (!%p740_p7)  }
  0x48   : > { %790 = vmatpush3.bf16.msra.mxu0 (!%p740_p7), %v926_v16  ;;  %861 = vmatpush3.bf16.msra.mxu1 (!%p740_p7), %v926_v16  ;;  %v297_v21 = vld [vmem:[#allocation3 + $0x20] sm:$0xff] (!%p740_p7)  ;;  %v932_v24 = vld [vmem:[%s1118_s9 + $0x30] sm:$0xff] (!%p740_p7)   ;;  %v933_v25 = vld [vmem:[%s1118_s9 + $0x38] sm:$0xff] (!%p740_p7)  }
  0x49   : > { %791 = vmatprep.subr.bf16.mxu0 (!%p740_p7), %v927_v17  ;;  %854 = vmatprep.subr.bf16.mxu1 (!%p740_p7), %v927_v17  ;;  %v930_v22 = vld [vmem:[%s1118_s9 + $0x20] sm:$0xff] (!%p740_p7)   ;;  %v294_v26 = vld [vmem:[#allocation3 + $0x8] sm:$0xff] (!%p740_p7)  ;;  %v295_v28 = vld [vmem:[#allocation3 + $0x10] sm:$0xff] (!%p740_p7) }
  0x4a   : > { %805 = vmatprep.mubr.bf16.mxu0 (!%p740_p7), %v293_v20  ;;  %813 = vmatprep.mubr.bf16.mxu1 (!%p740_p7), %v297_v21  ;;  %v298_v27 = vld [vmem:[#allocation3 + $0x28] sm:$0xff] (!%p740_p7)  ;;  %v299_v29 = vld [vmem:[#allocation3 + $0x30] sm:$0xff] (!%p740_p7)  ;;  %v296_v30 = vld [vmem:[#allocation3 + $0x18] sm:$0xff] (!%p740_p7) }
  0x4b   : > { %v300_v31 = vld [vmem:[#allocation3 + $0x38] sm:$0xff] (!%p740_p7) }
  0x4c   : > { %792 = vmatpush3.bf16.msra.mxu0 (!%p740_p7), %v927_v17  ;;  %862 = vmatpush3.bf16.msra.mxu1 (!%p740_p7), %v927_v17 }
  0x4d   : > { %793 = vmatprep.subr.bf16.mxu0 (!%p740_p7), %v928_v18  ;;  %855 = vmatprep.subr.bf16.mxu1 (!%p740_p7), %v928_v18 }
  0x50   : > { %794 = vmatpush3.bf16.msra.mxu0 %v928_v18  ;;  %863 = vmatpush3.bf16.msra.mxu1 %v928_v18 }
  0x51   : > { %795 = vmatprep.subr.bf16.mxu0 %v929_v19  ;;  %856 = vmatprep.subr.bf16.mxu1 %v929_v19 }
  0x54   : > { %796 = vmatpush3.bf16.msra.mxu0 %v929_v19  ;;  %864 = vmatpush3.bf16.msra.mxu1 %v929_v19 }
  0x55   : > { %797 = vmatprep.subr.bf16.mxu0 %v930_v22  ;;  %857 = vmatprep.subr.bf16.mxu1 %v930_v22 }
  0x58   : > { %798 = vmatpush3.bf16.msra.mxu0 %v930_v22  ;;  %865 = vmatpush3.bf16.msra.mxu1 %v930_v22 }
  0x59   : > { %799 = vmatprep.subr.bf16.mxu0 %v931_v23  ;;  %858 = vmatprep.subr.bf16.mxu1 %v931_v23 }
  0x5c   : > { %800 = vmatpush3.bf16.msra.mxu0 %v931_v23  ;;  %866 = vmatpush3.bf16.msra.mxu1 %v931_v23 }
  0x5d   : > { %801 = vmatprep.subr.bf16.mxu0 %v932_v24  ;;  %859 = vmatprep.subr.bf16.mxu1 %v932_v24 }
  0x60   : > { %802 = vmatpush3.bf16.msra.mxu0 %v932_v24  ;;  %867 = vmatpush3.bf16.msra.mxu1 %v932_v24 }
  0x61   : > { %803 = vmatprep.subr.bf16.mxu0 %v933_v25  ;;  %860 = vmatprep.subr.bf16.mxu1 %v933_v25 }
  0x64   : > { %804 = vmatpush3.bf16.msra.mxu0 %v933_v25  ;;  %868 = vmatpush3.bf16.msra.mxu1 %v933_v25 }
  0x67   : > { %806 = vmatmul.mubr.bf16.vlgmr.msra.gmra.mrb[0].mxu0 %v294_v26  ;;  %814 = vmatmul.mubr.bf16.vlgmr.msra.gmra.mrb[0].mxu1 %v298_v27 }
  0x68   : > { %809 = vmatprep.mubr.bf16.mxu0 %v295_v28  ;;  %817 = vmatprep.mubr.bf16.mxu1 %v299_v29 }
  0x6f   : > { %810 = vmatmul.mubr.bf16.gmra.mrb[4].mxu0 %v296_v30  ;;  %818 = vmatmul.mubr.bf16.gmra.mrb[4].mxu1 %v300_v31 }
 0x13a   : > { %v807_v32 = vpop.f32.mrb[0].mxu0  ;;  %v815_v33 = vpop.f32.mrb[0].mxu1 }
 0x13b   : > { %v399_v34 = vpop.f32.mrb[1].mxu0  ;;  %v431_v35 = vpop.f32.mrb[1].mxu1 }
 0x13c   : > { %v808_v36 = vpop.f32.mrb[2].mxu0  ;;  %v816_v37 = vpop.f32.mrb[2].mxu1 }
 0x13d   : > { %v463_v38 = vpack.c.bf16 %v808_v36, %v807_v32  ;;  %v467_v39 = vpack.c.bf16 %v816_v37, %v815_v33  ;;  %v402_v40 = vpop.f32.mrb[3].mxu0  ;;  %v434_v41 = vpop.f32.mrb[3].mxu1 }
 0x13e   : > { %v462_v42 = vpack.c.bf16 %v402_v40, %v399_v34  ;;  %v466_v43 = vpack.c.bf16 %v434_v41, %v431_v35 }
 0x13f   : > { %471 = vst [vmem:[#allocation3 + $0x8] sm:$0xff] %v463_v38  ;;  %475 = vst [vmem:[#allocation3 + $0x28] sm:$0xff] %v467_v39 }
 0x140   : > { %470 = vst [vmem:[#allocation3] sm:$0xff] %v462_v42  ;;  %474 = vst [vmem:[#allocation3 + $0x20] sm:$0xff] %v466_v43 }
 0x142   : > { %v811_v44 = vpop.f32.mrb[4].mxu0  ;;  %v819_v45 = vpop.f32.mrb[4].mxu1 }
 0x143   : > { %v415_v46 = vpop.f32.mrb[5].mxu0  ;;  %v447_v47 = vpop.f32.mrb[5].mxu1 }
 0x144   : > { %v812_v48 = vpop.f32.mrb[6].mxu0  ;;  %v820_v49 = vpop.f32.mrb[6].mxu1 }
 0x145   : > { %v465_v50 = vpack.c.bf16 %v812_v48, %v811_v44  ;;  %v469_v51 = vpack.c.bf16 %v820_v49, %v819_v45  ;;  %v418_v52 = vpop.f32.mrb[7].mxu0  ;;  %v450_v53 = vpop.f32.mrb[7].mxu1 }
 0x146   : > { %v464_v54 = vpack.c.bf16 %v418_v52, %v415_v46  ;;  %v468_v55 = vpack.c.bf16 %v450_v53, %v447_v47 }
 0x147   : > { %473 = vst [vmem:[#allocation3 + $0x18] sm:$0xff] %v465_v50  ;;  %477 = vst [vmem:[#allocation3 + $0x38] sm:$0xff] %v469_v51 }
 0x148   : > { %472 = vst [vmem:[#allocation3 + $0x10] sm:$0xff] %v464_v54  ;;  %476 = vst [vmem:[#allocation3 + $0x30] sm:$0xff] %v468_v55 }
 0x149 PF: > { %v486_v56 = vld [vmem:[#allocation3] sm:$0xff]  ;;  %v487_v57 = vld [vmem:[#allocation3 + $0x8] sm:$0xff]  ;;  %v480_v4 = vld [vmem:[#allocation2 + $0x10] sm:$0xff]  ;;  %p750_p4 = scmp.ge.s32.totalorder %s1051_s19, 2 }
 0x14a   : > { %821 = vmatprep.subr.bf16.mxu0 %v486_v56  ;;  %869 = vmatprep.subr.bf16.mxu1 %v486_v56  ;;  %v478_v58 = vld [vmem:[#allocation2] sm:$0xff]  ;;  %v491_v63 = vld [vmem:[#allocation3 + $0x28] sm:$0xff]  ;;  %v484_v5 = vld [vmem:[#allocation2 + $0x30] sm:$0xff] }
 0x14b   : > { %822 = vmatpush3.bf16.msra.mxu0 %v486_v56  ;;  %877 = vmatpush3.bf16.msra.mxu1 %v486_v56  ;;  %v482_v59 = vld [vmem:[#allocation2 + $0x20] sm:$0xff]  ;;  %v479_v2 = vld [vmem:[#allocation2 + $0x8] sm:$0xff]  ;;  %v481_v6 = vld [vmem:[#allocation2 + $0x18] sm:$0xff] }
 0x14c   : > { %823 = vmatprep.subr.bf16.mxu0 %v487_v57  ;;  %870 = vmatprep.subr.bf16.mxu1 %v487_v57  ;;  %v490_v62 = vld [vmem:[#allocation3 + $0x20] sm:$0xff]  ;;  %v483_v3 = vld [vmem:[#allocation2 + $0x28] sm:$0xff]  ;;  %v485_v7 = vld [vmem:[#allocation2 + $0x38] sm:$0xff] }
 0x14d   : > { %837 = vmatprep.mubr.bf16.mxu0 %v478_v58  ;;  %845 = vmatprep.mubr.bf16.mxu1 %v482_v59  ;;  %v749_v8 = vld [vmem:[%s164_s7] ss:$0 sm:$0xff] }
 0x14e   : > { %v489_v61 = vld [vmem:[#allocation3 + $0x18] sm:$0xff] }
 0x14f   : > { %v488_v60 = vld [vmem:[#allocation3 + $0x10] sm:$0xff]  ;;  %824 = vmatpush3.bf16.msra.mxu0 %v487_v57  ;;  %878 = vmatpush3.bf16.msra.mxu1 %v487_v57  ;;  %v493_v1 = vld [vmem:[#allocation3 + $0x38] sm:$0xff] }
 0x150   : > { %825 = vmatprep.subr.bf16.mxu0 %v488_v60  ;;  %871 = vmatprep.subr.bf16.mxu1 %v488_v60  ;;  %v492_v0 = vld [vmem:[#allocation3 + $0x30] sm:$0xff] }
 0x153   : > { %826 = vmatpush3.bf16.msra.mxu0 %v488_v60  ;;  %879 = vmatpush3.bf16.msra.mxu1 %v488_v60 }
 0x154   : > { %827 = vmatprep.subr.bf16.mxu0 %v489_v61  ;;  %872 = vmatprep.subr.bf16.mxu1 %v489_v61 }
 0x157   : > { %828 = vmatpush3.bf16.msra.mxu0 %v489_v61  ;;  %880 = vmatpush3.bf16.msra.mxu1 %v489_v61 }
 0x158   : > { %829 = vmatprep.subr.bf16.mxu0 %v490_v62  ;;  %873 = vmatprep.subr.bf16.mxu1 %v490_v62 }
 0x15b   : > { %830 = vmatpush3.bf16.msra.mxu0 %v490_v62  ;;  %881 = vmatpush3.bf16.msra.mxu1 %v490_v62 }
 0x15c   : > { %831 = vmatprep.subr.bf16.mxu0 %v491_v63  ;;  %874 = vmatprep.subr.bf16.mxu1 %v491_v63 }
 0x15f   : > { %832 = vmatpush3.bf16.msra.mxu0 %v491_v63  ;;  %882 = vmatpush3.bf16.msra.mxu1 %v491_v63 }
 0x160   : > { %833 = vmatprep.subr.bf16.mxu0 %v492_v0  ;;  %875 = vmatprep.subr.bf16.mxu1 %v492_v0 }
 0x163   : > { %834 = vmatpush3.bf16.msra.mxu0 %v492_v0  ;;  %883 = vmatpush3.bf16.msra.mxu1 %v492_v0 }
 0x164   : > { %835 = vmatprep.subr.bf16.mxu0 %v493_v1  ;;  %876 = vmatprep.subr.bf16.mxu1 %v493_v1 }
 0x167   : > { %836 = vmatpush3.bf16.msra.mxu0 %v493_v1  ;;  %884 = vmatpush3.bf16.msra.mxu1 %v493_v1 }
 0x16a   : > { %838 = vmatmul.mubr.bf16.vlgmr.msra.gmra.mrb[0].mxu0 %v479_v2  ;;  %846 = vmatmul.mubr.bf16.vlgmr.msra.gmra.mrb[0].mxu1 %v483_v3 }
 0x16b   : > { %841 = vmatprep.mubr.bf16.mxu0 %v480_v4  ;;  %849 = vmatprep.mubr.bf16.mxu1 %v484_v5 }
 0x172   : > { %842 = vmatmul.mubr.bf16.gmra.mrb[4].mxu0 %v481_v6  ;;  %850 = vmatmul.mubr.bf16.gmra.mrb[4].mxu1 %v485_v7 }
 0x23d   : > { %v839_v9 = vpop.f32.mrb[0].mxu0  ;;  %v847_v10 = vpop.f32.mrb[0].mxu1 }
 0x23e   : > { %v1195_v11 = vadd.f32 %v839_v9, %v749_v8  ;;  %v1197_v12 = vadd.f32 %v847_v10, %v749_v8  ;;  %v535_v13 = vpop.f32.mrb[1].mxu0  ;;  %v567_v14 = vpop.f32.mrb[1].mxu1 }
 0x23f   : > { %v536_v15 = vadd.f32 %v749_v8, %v535_v13  ;;  %v1199_v16 = vadd.f32 %v749_v8, %v567_v14  ;;  %v840_v17 = vpop.f32.mrb[2].mxu0  ;;  %v848_v18 = vpop.f32.mrb[2].mxu1 }
 0x240   : > { %v547_v19 = vadd.f32 %v840_v17, %v749_v8  ;;  %v1201_v20 = vadd.f32 %v848_v18, %v749_v8  ;;  %v538_v21 = vpop.f32.mrb[3].mxu0  ;;  %v570_v22 = vpop.f32.mrb[3].mxu1  ;;  %v604_v43 = vmax.f32 (!%p750_p4), %v1195_v11, 0.0  ;;  %v612_v55 = vmax.f32 (!%p750_p4), %v1197_v12, 0.0 }
 0x241   : > { %v539_v23 = vadd.f32 %v749_v8, %v538_v21  ;;  %v571_v24 = vadd.f32 %v749_v8, %v570_v22  ;;  %v602_v41 = vmax.f32 (!%p750_p4), %v536_v15, 0.0  ;;  %v610_v51 = vmax.f32 (!%p750_p4), %v1199_v16, 0.0 }
 0x242   : > { %v605_v44 = vmax.f32 (!%p750_p4), %v547_v19, 0.0  ;;  %v613_v56 = vmax.f32 (!%p750_p4), %v1201_v20, 0.0 }
 0x243   : > { %601 = sbr.rel (%p750_p4) target bundleno = 592 (0x250), region = 112  ;;  %v603_v42 = vmax.f32 (!%p750_p4), %v539_v23, 0.0  ;;  %v611_v52 = vmax.f32 (!%p750_p4), %v571_v24, 0.0 }
 0x244   : > { %v619_v50 = vpack.c.bf16 (!%p750_p4), %v605_v44, %v604_v43  ;;  %v623_v61 = vpack.c.bf16 (!%p750_p4), %v613_v56, %v612_v55 }
 0x245   : > { %v843_v25 = vpop.f32.mrb[4].mxu0  ;;  %v851_v26 = vpop.f32.mrb[4].mxu1  ;;  %v618_v49 = vpack.c.bf16 (!%p750_p4), %v603_v42, %v602_v41  ;;  %v622_v57 = vpack.c.bf16 (!%p750_p4), %v611_v52, %v610_v51 }
 0x246   : > { %v560_v27 = vadd.f32 %v843_v25, %v749_v8  ;;  %v1203_v28 = vadd.f32 %v851_v26, %v749_v8  ;;  %v551_v29 = vpop.f32.mrb[5].mxu0  ;;  %v583_v30 = vpop.f32.mrb[5].mxu1  ;;  %627 = vst [vmem:[#allocation3 + $0x8] sm:$0xff] (!%p750_p4), %v619_v50  ;;  %631 = vst [vmem:[#allocation3 + $0x28] sm:$0xff] (!%p750_p4), %v623_v61 }
 0x247   : > { %v552_v31 = vadd.f32 %v749_v8, %v551_v29  ;;  %v584_v32 = vadd.f32 %v749_v8, %v583_v30  ;;  %v844_v33 = vpop.f32.mrb[6].mxu0  ;;  %v852_v34 = vpop.f32.mrb[6].mxu1  ;;  %626 = vst [vmem:[#allocation3] sm:$0xff] (!%p750_p4), %v618_v49  ;;  %630 = vst [vmem:[#allocation3 + $0x20] sm:$0xff] (!%p750_p4), %v622_v57 }
 0x248   : > { %v563_v35 = vadd.f32 %v844_v33, %v749_v8  ;;  %v595_v36 = vadd.f32 %v852_v34, %v749_v8  ;;  %v554_v37 = vpop.f32.mrb[7].mxu0  ;;  %v586_v38 = vpop.f32.mrb[7].mxu1  ;;  %v608_v47 = vmax.f32 (!%p750_p4), %v560_v27, 0.0  ;;  %v616_v60 = vmax.f32 (!%p750_p4), %v1203_v28, 0.0 }
 0x249   : > { %v555_v39 = vadd.f32 %v749_v8, %v554_v37  ;;  %v587_v40 = vadd.f32 %v749_v8, %v586_v38  ;;  %v606_v45 = vmax.f32 (!%p750_p4), %v552_v31, 0.0  ;;  %v614_v58 = vmax.f32 (!%p750_p4), %v584_v32, 0.0 }
 0x24a   : > { %v609_v48 = vmax.f32 %v563_v35, 0.0  ;;  %v617_v62 = vmax.f32 %v595_v36, 0.0 }
 0x24b   : > { %v607_v46 = vmax.f32 %v555_v39, 0.0  ;;  %v615_v59 = vmax.f32 %v587_v40, 0.0 }
 0x24c   : > { %v621_v54 = vpack.c.bf16 %v609_v48, %v608_v47  ;;  %v625_v0 = vpack.c.bf16 %v617_v62, %v616_v60 }
 0x24d   : > { %v620_v53 = vpack.c.bf16 %v607_v46, %v606_v45  ;;  %v624_v63 = vpack.c.bf16 %v615_v59, %v614_v58 }
 0x24e   : > { %629 = vst [vmem:[#allocation3 + $0x18] sm:$0xff] %v621_v54  ;;  %633 = vst [vmem:[#allocation3 + $0x38] sm:$0xff] %v625_v0 }
 0x24f   : > { %628 = vst [vmem:[#allocation3 + $0x10] sm:$0xff] %v620_v53  ;;  %632 = vst [vmem:[#allocation3 + $0x30] sm:$0xff] %v624_v63 }
 0x250 PF: > { %p751_p5 = scmp.ne.s32.totalorder %s1051_s19, 2 }
 0x251   : > { %638 = vst [vmem:[%s1282_s4] sm:$0xff] (!%p751_p5), %v536_v15  ;;  %639 = vst [vmem:[%s1282_s4 + $0x8] sm:$0xff] (!%p751_p5), %v539_v23 }
 0x252   : > { %637 = sbr.rel (%p751_p5) target bundleno = 601 (0x259), region = 116  ;;  %640 = vst [vmem:[%s1282_s4 + $0x10] sm:$0xff] (!%p751_p5), %v1195_v11  ;;  %641 = vst [vmem:[%s1282_s4 + $0x18] sm:$0xff] (!%p751_p5), %v547_v19 }
 0x253   : > { %642 = vst [vmem:[%s1282_s4 + $0x20] sm:$0xff] (!%p751_p5), %v552_v31  ;;  %643 = vst [vmem:[%s1282_s4 + $0x28] sm:$0xff] (!%p751_p5), %v555_v39 }
 0x254   : > { %644 = vst [vmem:[%s1282_s4 + $0x30] sm:$0xff] (!%p751_p5), %v560_v27  ;;  %645 = vst [vmem:[%s1282_s4 + $0x38] sm:$0xff] (!%p751_p5), %v563_v35 }
 0x255   : > { %646 = vst [vmem:[%s1282_s4 + $0x40] sm:$0xff] (!%p751_p5), %v1199_v16  ;;  %647 = vst [vmem:[%s1282_s4 + $0x48] sm:$0xff] (!%p751_p5), %v571_v24 }
 0x256   : > { %648 = vst [vmem:[%s1282_s4 + $0x50] sm:$0xff] (!%p751_p5), %v1197_v12  ;;  %649 = vst [vmem:[%s1282_s4 + $0x58] sm:$0xff] (!%p751_p5), %v1201_v20 }
 0x257   : > { %650 = vst [vmem:[%s1282_s4 + $0x60] sm:$0xff] (!%p751_p5), %v584_v32  ;;  %651 = vst [vmem:[%s1282_s4 + $0x68] sm:$0xff] (!%p751_p5), %v587_v40 }
 0x258   : > { %652 = vst [vmem:[%s1282_s4 + $0x70] sm:$0xff] (!%p751_p5), %v1203_v28  ;;  %653 = vst [vmem:[%s1282_s4 + $0x78] sm:$0xff] (!%p751_p5), %v595_v36 }
 0x259 PF: > { %p14_p6 = scmp.ge.s32.totalorder %s1054_s20, 5   ;;  %s1286_s15 = smov %s994_s16 }
 0x25a   : > { %s1287_s16 = smov %s998_s17  ;;  %s1288_s17 = smov %s1064_s23 }
 0x25b   : > { %s1289_s18 = smov %s1054_s20  ;;  %16 = sbr.rel (!%p14_p6) target bundleno = 3 (0x3), region = 169 }
 0x262   :  { %665 = vsyncpa [#allocation6], 1 }
 0x263   :  { %667 = vsyncpa [#allocation6 + $0x1], 1 }
 0x264   :  { %668 = vsyncmov [#allocation4] }
 0x267   :  { %s669_s12 = vpop.sfrf %668 }
 0x268   :  { %p754_p10 = scmp.ne.s32.totalorder %s669_s12, 0 }
 0x26a   :  { %673 = shalt.err (%p754_p10)  }
 0x26b   :  { %675 = vsyncmov [#allocation4 + $0x1] }
 0x26e   :  { %s676_s13 = vpop.sfrf %675 }
 0x26f   :  { %p755_p12 = scmp.ne.s32.totalorder %s676_s13, 0 }
 0x271   :  { %680 = shalt.err (%p755_p12)  }

</bundles_post_ra>
